<compile_context>
chip_gen: v5e
topology: v5e:2x2
jax: 0.10.0
libtpu: 0.0.40
codegen_flags: <defaults>
</compile_context>

<pallas_src>
import jax
import jax.numpy as jnp
from jax.experimental import pallas as pl
from jax.experimental.pallas import tpu as pltpu


def _round_up(x, m):
    return ((x + m - 1) // m) * m


def mlp3_kernel(x_ref, w1_ref, b1_ref, w2_ref, b2_ref, w3_ref, b3_ref,
                o_ref, h_ref):
    # Layer 1: bf16 MXU matmul, f32 accumulate; bias + ReLU in f32 on the VPU.
    # (Dropout == identity in eval mode.)
    h1 = jnp.dot(x_ref[...], w1_ref[...], preferred_element_type=jnp.float32)
    h_ref[...] = jnp.maximum(h1 + b1_ref[...], 0.0)

    # Layer 2: reuse the same VMEM scratch buffer for the activation.
    h2 = jnp.dot(h_ref[...].astype(w2_ref.dtype), w2_ref[...],
                 preferred_element_type=jnp.float32)
    h_ref[...] = jnp.maximum(h2 + b2_ref[...], 0.0)

    # Layer 3 (output head) — lane-dense store (out dim padded to 128).
    out = jnp.dot(h_ref[...].astype(w3_ref.dtype), w3_ref[...],
                  preferred_element_type=jnp.float32)
    o_ref[...] = (out + b3_ref[...]).astype(o_ref.dtype)


def mlp3_forward(x, params, *, tile_b=256, compute_dtype=jnp.bfloat16):
    """x: [B, input_dim].  params: dict of w1,b1,w2,b2,w3,b3 with weights stored
    as [in_features, out_features] (transposed vs. PyTorch)."""
    w1, b1, w2, b2, w3, b3 = (params["w1"], params["b1"], params["w2"],
                              params["b2"], params["w3"], params["b3"])
    B, input_dim = x.shape
    hidden_dim = w1.shape[1]
    output_dim = w3.shape[1]
    out_dtype = x.dtype

    # ---- pad feature dims to lane width (128) and batch to the tile size ----
    in_p = _round_up(input_dim, 128)
    hid_p = _round_up(hidden_dim, 128)
    out_p = _round_up(output_dim, 128)          # lane-dense output stores
    tile_b = _round_up(max(8, min(tile_b, _round_up(B, 8))), 8)
    B_p = _round_up(B, tile_b)
    grid = (B_p // tile_b,)

    def pad2(a, r, c):
        return jnp.pad(a, ((0, r - a.shape[0]), (0, c - a.shape[1])))

    # bf16 for everything the MXU consumes; biases stay f32 (added post-dot).
    x_p = pad2(x, B_p, in_p).astype(compute_dtype)
    w1_p = pad2(w1, in_p, hid_p).astype(compute_dtype)
    w2_p = pad2(w2, hid_p, hid_p).astype(compute_dtype)
    w3_p = pad2(w3, hid_p, out_p).astype(compute_dtype)
    b1_p = pad2(b1, 1, hid_p).astype(jnp.float32)
    b2_p = pad2(b2, 1, hid_p).astype(jnp.float32)
    b3_p = pad2(b3, 1, out_p).astype(jnp.float32)

    # Activation/output tiles stream over the batch; weights stay resident.
    x_spec = pl.BlockSpec((tile_b, in_p), lambda i: (i, 0))
    o_spec = pl.BlockSpec((tile_b, out_p), lambda i: (i, 0))
    resident = lambda shape: pl.BlockSpec(shape, lambda i, _s=shape: (0,) * len(_s))

    # ---- VMEM budget (weights + double-buffered activation tiles + scratch) ----
    bpe = jnp.dtype(compute_dtype).itemsize
    weight_bytes = (in_p * hid_p + hid_p * hid_p + hid_p * out_p) * bpe
    bias_bytes = (2 * hid_p + out_p) * 4
    act_bytes = tile_b * (in_p * bpe + out_p * jnp.dtype(out_dtype).itemsize)
    scratch_bytes = tile_b * hid_p * 4
    vmem_bytes = int((2 * weight_bytes + 2 * bias_bytes + 2 * act_bytes
                      + scratch_bytes + (1 << 20)) * 1.25)
    vmem_bytes = min(max(vmem_bytes, 4 << 20), 64 << 20)   # cap: v7x has 64 MiB

    out_padded = pl.pallas_call(
        mlp3_kernel,
        out_shape=jax.ShapeDtypeStruct((B_p, out_p), out_dtype),
        grid_spec=pltpu.PrefetchScalarGridSpec(
            num_scalar_prefetch=0,
            grid=grid,
            in_specs=[
                x_spec,
                resident((in_p, hid_p)), resident((1, hid_p)),
                resident((hid_p, hid_p)), resident((1, hid_p)),
                resident((hid_p, out_p)), resident((1, out_p)),
            ],
            out_specs=o_spec,
            scratch_shapes=[pltpu.VMEM((tile_b, hid_p), jnp.float32)],
        ),
        compiler_params=pltpu.CompilerParams(
            dimension_semantics=("parallel",),
            vmem_limit_bytes=vmem_bytes,
        ),
    )(x_p, w1_p, b1_p, w2_p, b2_p, w3_p, b3_p)

    return out_padded[:B, :output_dim]


def init_params(key, input_dim, hidden_dim, output_dim, dtype=jnp.float32):
    """Mimics PyTorch nn.Linear init (uniform +/- 1/sqrt(fan_in)).
    Weights are stored transposed: [in_features, out_features]."""
    ks = jax.random.split(key, 6)

    def linear(kw, kb, fan_in, fan_out):
        bound = 1.0 / (fan_in ** 0.5)
        w = jax.random.uniform(kw, (fan_in, fan_out), dtype, -bound, bound)
        b = jax.random.uniform(kb, (1, fan_out), dtype, -bound, bound)
        return w, b

    w1, b1 = linear(ks[0], ks[1], input_dim, hidden_dim)
    w2, b2 = linear(ks[2], ks[3], hidden_dim, hidden_dim)
    w3, b3 = linear(ks[4], ks[5], hidden_dim, output_dim)
    return dict(w1=w1, b1=b1, w2=w2, b2=b2, w3=w3, b3=b3)


def mlp3_reference(x, p, compute_dtype=jnp.bfloat16):
    """Reference with matched precision (bf16 MXU inputs, f32 accumulation)."""
    cd = compute_dtype
    h1 = jnp.maximum(
        jnp.dot(x.astype(cd), p["w1"].astype(cd),
                preferred_element_type=jnp.float32) + p["b1"], 0.0)
    h2 = jnp.maximum(
        jnp.dot(h1.astype(cd), p["w2"].astype(cd),
                preferred_element_type=jnp.float32) + p["b2"], 0.0)
    out = jnp.dot(h2.astype(cd), p["w3"].astype(cd),
                  preferred_element_type=jnp.float32) + p["b3"]
    return out.astype(x.dtype)


if __name__ == "__main__":
    # Small shapes consistent with the module: batch=2, input_dim=16,
    # hidden_dim=32, output_dim=8.  (At these sizes the kernel is padding-
    # dominated; it only pays off at realistic batch / hidden sizes.)
    batch, input_dim, hidden_dim, output_dim = 2, 16, 32, 8

    key = jax.random.PRNGKey(0)
    kx, kp = jax.random.split(key)
    x = jax.random.normal(kx, (batch, input_dim), dtype=jnp.float32)
    params = init_params(kp, input_dim, hidden_dim, output_dim)

    out = mlp3_forward(x, params)
    out = jax.block_until_ready(out)

    ref = mlp3_reference(x, params)
    assert out.shape == (batch, output_dim), out.shape
    max_err = jnp.max(jnp.abs(out - ref))
    assert jnp.allclose(out, ref, atol=1e-3, rtol=1e-3), f"max abs err {max_err}"

    print("KERNEL_OK")
</pallas_src>

<mosaic_0001>
module attributes {stable_mosaic.version = 11 : i64} {
  func.func @mlp3_kernel(%arg0: i32, %arg1: memref<8x128xbf16, #tpu.memory_space<vmem>>, %arg2: memref<128x128xbf16, #tpu.memory_space<vmem>>, %arg3: memref<1x128xf32, #tpu.memory_space<vmem>>, %arg4: memref<128x128xbf16, #tpu.memory_space<vmem>>, %arg5: memref<1x128xf32, #tpu.memory_space<vmem>>, %arg6: memref<128x128xbf16, #tpu.memory_space<vmem>>, %arg7: memref<1x128xf32, #tpu.memory_space<vmem>>, %arg8: memref<8x128xf32, #tpu.memory_space<vmem>>, %arg9: memref<8x128xf32, #tpu.memory_space<vmem>>) attributes {dimension_semantics = [#tpu.dimension_semantics<parallel>], iteration_bounds = array<i64: 1>, scalar_prefetch = 0 : i64, scratch_operands = 1 : i64, tpu.core_type = #tpu.core_type<tc>, window_params = [{transform_indices = @transform_0, window_bounds = array<i64: 8, 128>}, {pipeline_mode = #tpu.pipeline_mode<synchronous>, transform_indices = @transform_1, window_bounds = array<i64: 128, 128>}, {pipeline_mode = #tpu.pipeline_mode<synchronous>, transform_indices = @transform_2, window_bounds = array<i64: 1, 128>}, {pipeline_mode = #tpu.pipeline_mode<synchronous>, transform_indices = @transform_3, window_bounds = array<i64: 128, 128>}, {pipeline_mode = #tpu.pipeline_mode<synchronous>, transform_indices = @transform_4, window_bounds = array<i64: 1, 128>}, {pipeline_mode = #tpu.pipeline_mode<synchronous>, transform_indices = @transform_5, window_bounds = array<i64: 128, 128>}, {pipeline_mode = #tpu.pipeline_mode<synchronous>, transform_indices = @transform_6, window_bounds = array<i64: 1, 128>}, {transform_indices = @transform_7, window_bounds = array<i64: 8, 128>}]} {
    %c0 = arith.constant 0 : index
    %c0_0 = arith.constant 0 : index
    %0 = vector.load %arg1[%c0, %c0_0] : memref<8x128xbf16, #tpu.memory_space<vmem>>, vector<8x128xbf16>
    %c0_1 = arith.constant 0 : index
    %c0_2 = arith.constant 0 : index
    %1 = vector.load %arg2[%c0_1, %c0_2] : memref<128x128xbf16, #tpu.memory_space<vmem>>, vector<128x128xbf16>
    %cst = arith.constant dense<0.000000e+00> : vector<8x128xf32>
    %2 = tpu.matmul %0, %1, %cst {dimension_numbers = #tpu.dot_dimension_numbers<[1], [0], [0], [1], [0, 0, 1, 1], [], []>} : vector<8x128xbf16>, vector<128x128xbf16>, vector<8x128xf32> -> vector<8x128xf32>
    %c0_3 = arith.constant 0 : index
    %c0_4 = arith.constant 0 : index
    %3 = vector.load %arg3[%c0_3, %c0_4] : memref<1x128xf32, #tpu.memory_space<vmem>>, vector<1x128xf32>
    %4 = vector.broadcast %3 : vector<1x128xf32> to vector<8x128xf32>
    %5 = arith.addf %2, %4 : vector<8x128xf32>
    %cst_5 = arith.constant 0.000000e+00 : f32
    %6 = vector.broadcast %cst_5 : f32 to vector<8x128xf32>
    %7 = arith.maximumf %5, %6 : vector<8x128xf32>
    %c0_6 = arith.constant 0 : index
    %c0_7 = arith.constant 0 : index
    %8 = vector.load %arg9[%c0_6, %c0_7] : memref<8x128xf32, #tpu.memory_space<vmem>>, vector<8x128xf32>
    tpu.vector_store %arg9[%c0_6, %c0_7], %7 {strides = array<i32>} : memref<8x128xf32, #tpu.memory_space<vmem>>, vector<8x128xf32>,
    %c0_8 = arith.constant 0 : index
    %c0_9 = arith.constant 0 : index
    %9 = vector.load %arg9[%c0_8, %c0_9] : memref<8x128xf32, #tpu.memory_space<vmem>>, vector<8x128xf32>
    %10 = arith.truncf %9 : vector<8x128xf32> to vector<8x128xbf16>
    %c0_10 = arith.constant 0 : index
    %c0_11 = arith.constant 0 : index
    %11 = vector.load %arg4[%c0_10, %c0_11] : memref<128x128xbf16, #tpu.memory_space<vmem>>, vector<128x128xbf16>
    %cst_12 = arith.constant dense<0.000000e+00> : vector<8x128xf32>
    %12 = tpu.matmul %10, %11, %cst_12 {dimension_numbers = #tpu.dot_dimension_numbers<[1], [0], [0], [1], [0, 0, 1, 1], [], []>} : vector<8x128xbf16>, vector<128x128xbf16>, vector<8x128xf32> -> vector<8x128xf32>
    %c0_13 = arith.constant 0 : index
    %c0_14 = arith.constant 0 : index
    %13 = vector.load %arg5[%c0_13, %c0_14] : memref<1x128xf32, #tpu.memory_space<vmem>>, vector<1x128xf32>
    %14 = vector.broadcast %13 : vector<1x128xf32> to vector<8x128xf32>
    %15 = arith.addf %12, %14 : vector<8x128xf32>
    %cst_15 = arith.constant 0.000000e+00 : f32
    %16 = vector.broadcast %cst_15 : f32 to vector<8x128xf32>
    %17 = arith.maximumf %15, %16 : vector<8x128xf32>
    %c0_16 = arith.constant 0 : index
    %c0_17 = arith.constant 0 : index
    %18 = vector.load %arg9[%c0_16, %c0_17] : memref<8x128xf32, #tpu.memory_space<vmem>>, vector<8x128xf32>
    tpu.vector_store %arg9[%c0_16, %c0_17], %17 {strides = array<i32>} : memref<8x128xf32, #tpu.memory_space<vmem>>, vector<8x128xf32>,
    %c0_18 = arith.constant 0 : index
    %c0_19 = arith.constant 0 : index
    %19 = vector.load %arg9[%c0_18, %c0_19] : memref<8x128xf32, #tpu.memory_space<vmem>>, vector<8x128xf32>
    %20 = arith.truncf %19 : vector<8x128xf32> to vector<8x128xbf16>
    %c0_20 = arith.constant 0 : index
    %c0_21 = arith.constant 0 : index
    %21 = vector.load %arg6[%c0_20, %c0_21] : memref<128x128xbf16, #tpu.memory_space<vmem>>, vector<128x128xbf16>
    %cst_22 = arith.constant dense<0.000000e+00> : vector<8x128xf32>
    %22 = tpu.matmul %20, %21, %cst_22 {dimension_numbers = #tpu.dot_dimension_numbers<[1], [0], [0], [1], [0, 0, 1, 1], [], []>} : vector<8x128xbf16>, vector<128x128xbf16>, vector<8x128xf32> -> vector<8x128xf32>
    %c0_23 = arith.constant 0 : index
    %c0_24 = arith.constant 0 : index
    %23 = vector.load %arg7[%c0_23, %c0_24] : memref<1x128xf32, #tpu.memory_space<vmem>>, vector<1x128xf32>
    %24 = vector.broadcast %23 : vector<1x128xf32> to vector<8x128xf32>
    %25 = arith.addf %22, %24 : vector<8x128xf32>
    %c0_25 = arith.constant 0 : index
    %c0_26 = arith.constant 0 : index
    %26 = vector.load %arg8[%c0_25, %c0_26] : memref<8x128xf32, #tpu.memory_space<vmem>>, vector<8x128xf32>
    tpu.vector_store %arg8[%c0_25, %c0_26], %25 {strides = array<i32>} : memref<8x128xf32, #tpu.memory_space<vmem>>, vector<8x128xf32>,
    return
  }
  func.func @transform_0(%arg0: i32) -> (i32, i32) {
    %c0_i32 = arith.constant 0 : i32
    %c0_i32_0 = arith.constant 0 : i32
    return %arg0, %c0_i32 : i32, i32
  }
  func.func @transform_1(%arg0: i32) -> (i32, i32) {
    %c0_i32 = arith.constant 0 : i32
    %c0_i32_0 = arith.constant 0 : i32
    %c0_i32_1 = arith.constant 0 : i32
    return %c0_i32, %c0_i32_0 : i32, i32
  }
  func.func @transform_2(%arg0: i32) -> (i32, i32) {
    %c0_i32 = arith.constant 0 : i32
    %c0_i32_0 = arith.constant 0 : i32
    %c0_i32_1 = arith.constant 0 : i32
    return %c0_i32, %c0_i32_0 : i32, i32
  }
  func.func @transform_3(%arg0: i32) -> (i32, i32) {
    %c0_i32 = arith.constant 0 : i32
    %c0_i32_0 = arith.constant 0 : i32
    %c0_i32_1 = arith.constant 0 : i32
    return %c0_i32, %c0_i32_0 : i32, i32
  }
  func.func @transform_4(%arg0: i32) -> (i32, i32) {
    %c0_i32 = arith.constant 0 : i32
    %c0_i32_0 = arith.constant 0 : i32
    %c0_i32_1 = arith.constant 0 : i32
    return %c0_i32, %c0_i32_0 : i32, i32
  }
  func.func @transform_5(%arg0: i32) -> (i32, i32) {
    %c0_i32 = arith.constant 0 : i32
    %c0_i32_0 = arith.constant 0 : i32
    %c0_i32_1 = arith.constant 0 : i32
    return %c0_i32, %c0_i32_0 : i32, i32
  }
  func.func @transform_6(%arg0: i32) -> (i32, i32) {
    %c0_i32 = arith.constant 0 : i32
    %c0_i32_0 = arith.constant 0 : i32
    %c0_i32_1 = arith.constant 0 : i32
    return %c0_i32, %c0_i32_0 : i32, i32
  }
  func.func @transform_7(%arg0: i32) -> (i32, i32) {
    %c0_i32 = arith.constant 0 : i32
    %c0_i32_0 = arith.constant 0 : i32
    return %arg0, %c0_i32 : i32, i32
  }
}

</mosaic_0001>

<bundles_post_ra>
// kernel: tpu_custom_call.1
= control target key start
LH: loop header
LB: loop body
LE: loop exit
PB: predicated region body
PF: predicated region fallthrough
CT: control target
= control target key end

     0   :  { %12 = vsyncpa [#allocation4], 0  ;;  %s689_s0 = inlined_call_operand.hbm [shape: bf16[8,128], index: 0, kind: input, shape index: {}]   ;;  %s690_s1 = inlined_call_operand.hbm [shape: bf16[128,128], index: 1, kind: input, shape index: {}]   ;;  %s691_s2 = inlined_call_operand.vmem [shape: f32[1,128], index: 2, kind: input, shape index: {}]   ;;  %s692_s3 = inlined_call_operand.hbm [shape: bf16[128,128], index: 3, kind: input, shape index: {}]   ;;  %s693_s4 = inlined_call_operand.vmem [shape: f32[1,128], index: 4, kind: input, shape index: {}]   ;;  %s694_s5 = inlined_call_operand.hbm [shape: bf16[128,128], index: 5, kind: input, shape index: {}]   ;;  %s695_s6 = inlined_call_operand.vmem [shape: f32[1,128], index: 6, kind: input, shape index: {}]   ;;  %s696_s7 = inlined_call_operand.hbm [shape: f32[8,128], index: 7, kind: output, shape index: {}]  }
   0x1   :  { %13 = vsyncpa [#allocation7], 0 }
   0x2   :  { %14 = vsyncpa [#allocation10], 0  ;;  %s31_s26 = sshll.u32 %s690_s1, 4  ;;  %s32_s26 = int_to_ptr.hbm [resolvable:$true] %s31_s26 }
   0x3   :  { %15 = vsyncpa [#allocation5], 0  ;;  %s618_s27 = smov [#allocation6]   ;;  %s21_s8 = sshll.u32 %s689_s0, 4  ;;  %s22_s8 = int_to_ptr.hbm [resolvable:$true] %s21_s8 }
   0x4   :  { %s33_s28 = sshll.u32 %s618_s27, 4  ;;  %s619_s9 = smov 64   ;;  %s34_s28 = int_to_ptr.vmem [resolvable:$true] %s33_s28 }
   0x5   :  { %s620_s10 = smov 4   ;;  %s621_s11 = smov [#allocation3]  }
   0x6   :  { %39 = dma.hbm_to_vmem [thread:$0]  %s32_s26, 1024, %s34_s28, [#allocation7], %s619_s9, %s619_s9, %s620_s10  }
   0x7   :  { %s23_s12 = sshll.u32 %s621_s11, 4  ;;  %s46_s15 = sshll.u32 %s692_s3, 4  ;;  %s24_s12 = int_to_ptr.vmem [resolvable:$true] %s23_s12  ;;  %s47_s15 = int_to_ptr.hbm [resolvable:$true] %s46_s15 }
   0x8   :  { %26 = dma.hbm_to_vmem [thread:$0]  %s22_s8, 64, %s24_s12, [#allocation4]  }
   0x9   :  { %s61_s17 = sshll.u32 %s694_s5, 4  ;;  %s622_s18 = smov [#allocation8]   ;;  %s62_s17 = int_to_ptr.hbm [resolvable:$true] %s61_s17 }
   0xa   :  { %s48_s19 = sshll.u32 %s622_s18, 4  ;;  %s623_s0 = smov [#allocation9]   ;;  %s49_s19 = int_to_ptr.vmem [resolvable:$true] %s48_s19 }
   0xb   :  { %54 = dma.hbm_to_vmem [thread:$0]  %s47_s15, 1024, %s49_s19, [#allocation7], %s619_s9, %s619_s9, %s620_s10  }
   0xc   :  { %s63_s20 = sshll.u32 %s623_s0, 4  ;;  %s64_s20 = int_to_ptr.vmem [resolvable:$true] %s63_s20 }
   0xd   :  { %69 = dma.hbm_to_vmem [thread:$0]  %s62_s17, 1024, %s64_s20, [#allocation10], %s619_s9, %s619_s9, %s620_s10  }
   0xe   :  { %610 = dma.done.wait [#allocation4], 64  }
   0xf   :  { %611 = vsyncadd [#allocation4], 4294967232 }
  0x10   :  { %612 = dma.done.wait [#allocation7], 2048  }
  0x11   :  { %613 = vsyncadd [#allocation7], 4294965248 }
  0x12   :  { %614 = dma.done.wait [#allocation10], 1024  }
  0x13   :  { %615 = vsyncadd [#allocation10], 4294966272  ;;  %v463_v0 = vld [vmem:[#allocation6 + $0x38] sm:$0xff]  ;;  %v462_v1 = vld [vmem:[#allocation6 + $0x30] sm:$0xff]  ;;  %s624_s24 = smov [#allocation11]   ;;  %s348_s28 = sshll.u32 %s696_s7, 4  ;;  %s349_s28 = int_to_ptr.hbm [resolvable:$true] %s348_s28 }
  0x14   :  { %157 = vmatpush.bf16.msra.mxu0 %v463_v0  ;;  %v471_v2 = vld [vmem:[#allocation8 + $0x38] sm:$0xff]  ;;  %v470_v3 = vld [vmem:[#allocation8 + $0x30] sm:$0xff]  ;;  %v461_v4 = vld [vmem:[#allocation6 + $0x28] sm:$0xff]  ;;  %s346_s25 = sshll.u32 %s624_s24, 4  ;;  %s347_s25 = int_to_ptr.vmem [resolvable:$true] %s346_s25 }
  0x15   :  { %242 = vmatpush.bf16.msra.mxu1 %v471_v2  ;;  %v469_v5 = vld [vmem:[#allocation8 + $0x28] sm:$0xff]  ;;  %v460_v6 = vld [vmem:[#allocation6 + $0x20] sm:$0xff]  ;;  %v459_v8 = vld [vmem:[#allocation6 + $0x18] sm:$0xff] }
  0x16   :  { %v468_v7 = vld [vmem:[#allocation8 + $0x20] sm:$0xff]  ;;  %v467_v9 = vld [vmem:[#allocation8 + $0x18] sm:$0xff]  ;;  %v458_v10 = vld [vmem:[#allocation6 + $0x10] sm:$0xff] }
  0x17   :  { %v466_v11 = vld [vmem:[#allocation8 + $0x10] sm:$0xff]  ;;  %v457_v12 = vld [vmem:[#allocation6 + $0x8] sm:$0xff]  ;;  %v456_v13 = vld [vmem:[#allocation6] sm:$0xff] }
  0x18   :  { %158 = vmatpush.bf16.msra.mxu0 %v462_v1  ;;  %v88_v14 = vld [vmem:[#allocation3] sm:$0xf]  ;;  %v465_v15 = vld [vmem:[#allocation8 + $0x8] sm:$0xff]  ;;  %v464_v16 = vld [vmem:[#allocation8] sm:$0xff] }
  0x19   :  { %243 = vmatpush.bf16.msra.mxu1 %v470_v3  ;;  %v479_v17 = vld [vmem:[#allocation9 + $0x38] sm:$0xff]  ;;  %v478_v18 = vld [vmem:[#allocation9 + $0x30] sm:$0xff]  ;;  %v477_v19 = vld [vmem:[#allocation9 + $0x28] sm:$0xff] }
  0x1a   :  { %327 = vmatpush.bf16.msra.mxu2 %v479_v17  ;;  %v476_v20 = vld [vmem:[#allocation9 + $0x20] sm:$0xff]  ;;  %v475_v21 = vld [vmem:[#allocation9 + $0x18] sm:$0xff]  ;;  %v474_v22 = vld [vmem:[#allocation9 + $0x10] sm:$0xff] }
  0x1b   :  { %v487_v23 = vld [vmem:[%s691_s2] ss:$0 sm:$0xff]  ;;  %v473_v29 = vld [vmem:[#allocation9 + $0x8] sm:$0xff]  ;;  %v472_v30 = vld [vmem:[#allocation9] sm:$0xff] }
  0x1c   :  { %159 = vmatpush.bf16.msra.mxu0 %v461_v4  ;;  %v488_v31 = vld [vmem:[%s693_s4] ss:$0 sm:$0xff] }
  0x1d   :  { %244 = vmatpush.bf16.msra.mxu1 %v469_v5  ;;  %v489_v37 = vld [vmem:[%s695_s6] ss:$0 sm:$0xff] }
  0x1e   :  { %328 = vmatpush.bf16.msra.mxu2 %v478_v18 }
  0x20   :  { %160 = vmatpush.bf16.msra.mxu0 %v460_v6 }
  0x21   :  { %245 = vmatpush.bf16.msra.mxu1 %v468_v7 }
  0x22   :  { %329 = vmatpush.bf16.msra.mxu2 %v477_v19 }
  0x24   :  { %161 = vmatpush.bf16.msra.mxu0 %v459_v8 }
  0x25   :  { %246 = vmatpush.bf16.msra.mxu1 %v467_v9 }
  0x26   :  { %330 = vmatpush.bf16.msra.mxu2 %v476_v20 }
  0x28   :  { %162 = vmatpush.bf16.msra.mxu0 %v458_v10 }
  0x29   :  { %247 = vmatpush.bf16.msra.mxu1 %v466_v11 }
  0x2a   :  { %331 = vmatpush.bf16.msra.mxu2 %v475_v21 }
  0x2c   :  { %163 = vmatpush.bf16.msra.mxu0 %v457_v12 }
  0x2d   :  { %248 = vmatpush.bf16.msra.mxu1 %v465_v15 }
  0x2e   :  { %332 = vmatpush.bf16.msra.mxu2 %v474_v22 }
  0x30   :  { %164 = vmatpush.bf16.msra.mxu0 %v456_v13 }
  0x31   :  { %249 = vmatpush.bf16.msra.mxu1 %v464_v16 }
  0x32   :  { %333 = vmatpush.bf16.msra.mxu2 %v473_v29 }
  0x33   :  { %165 = vmatmul.bf16.vlgmr.msra.gmra.mxu0 %v88_v14 }
  0x36   :  { %334 = vmatpush.bf16.msra.mxu2 %v472_v30 }
  0xb0   :  { %v166_v24 = vpop.f32.mrf.mxu0 }
  0xb1   :  { %v167_v25 = vadd.f32 %v487_v23, %v166_v24 }
  0xb3   :  { %v170_v26 = vmax.f32 %v167_v25, 0.0 }
  0xb5   :  { %v173_v27 = vpack.c.bf16 %v170_v26, %v170_v26 }
  0xb7   :  { %250 = vmatmul.bf16.vlgmr.msra.gmra.mxu1 %v173_v27 }
  0xb8   :  { %v168_v28 = vpop.f32.mrf.mxu0 }
 0x134   :  { %v251_v32 = vpop.f32.mrf.mxu1 }
 0x135   :  { %v252_v33 = vadd.f32 %v488_v31, %v251_v32 }
 0x137   :  { %v255_v34 = vmax.f32 %v252_v33, 0.0 }
 0x139   :  { %v258_v35 = vpack.c.bf16 %v255_v34, %v255_v34 }
 0x13b   :  { %335 = vmatmul.bf16.vlgmr.msra.gmra.mxu2 %v258_v35 }
 0x13c   :  { %v253_v36 = vpop.f32.mrf.mxu1 }
 0x1be   :  { %v336_v38 = vpop.f32.mrf.mxu2 }
 0x1bf   :  { %v337_v39 = vadd.f32 %v489_v37, %v336_v38 }
 0x1c1   :  { %340 = vst [vmem:[#allocation11] sm:$0xff] %v337_v39 }
 0x1c2   :  { %351 = dma.vmem_to_hbm [thread:$0]  %s347_s25, 128, %s349_s28, [#allocation5]  }
 0x1c6   :  { %v338_v40 = vpop.f32.mrf.mxu2 }
 0x1c7   :  { %616 = dma.done.wait [#allocation5], 128  }
 0x1c8   :  { %617 = vsyncadd [#allocation5], 4294967168 }
 0x1c9   :  { %356 = vsyncpa [#allocation4], 1 }
 0x1ca   :  { %357 = vsyncpa [#allocation7], 1 }
 0x1cb   :  { %358 = vsyncpa [#allocation10], 1 }
 0x1cc   :  { %359 = vsyncpa [#allocation5], 1 }

</bundles_post_ra>
